<compile_context>
chip_gen: v7x
topology: tpu7x:2x2x1
jax: 0.10.0
libtpu: 0.0.40
codegen_flags: <defaults>
</compile_context>

<pallas_src>
import functools

import jax
import jax.numpy as jnp
from jax import lax
from jax.experimental import pallas as pl
from jax.experimental.pallas import tpu as pltpu


_LANE = 128
# Safe on every generation: <= 64 MiB/TC on v7x, well under 128 MiB on v5e/v6e,
# and far above the 16/32 MiB scoped defaults so big tiles are not rejected.
_VMEM_LIMIT_BYTES = 48 * 1024 * 1024


def _round_up(x, m):
    return (x + m - 1) // m * m


def _sublane_align(dtype):
    # Second-to-last block dim must be a multiple of (32 bytes / itemsize):
    # f32 -> 8, bf16 -> 16, int8/fp8 -> 32.
    return max(8, 32 // jnp.dtype(dtype).itemsize)


def _pad_and_tile(dim, align, max_tile):
    """(padded_dim, tile): tile % align == 0 and tile divides padded_dim."""
    padded = _round_up(dim, align)
    if padded <= max_tile:
        return padded, padded
    tile = (max_tile // align) * align
    return _round_up(dim, tile), tile


def _divisor_tile(padded_dim, align, max_tile):
    """Largest multiple of `align` that divides `padded_dim`, capped at max_tile."""
    assert padded_dim % align == 0
    best = align
    t = align
    limit = min(padded_dim, max_tile)
    while t <= limit:
        if padded_dim % t == 0:
            best = t
        t += align
    return best


def prepare_linear_params(weight, bias, *, mxu_dtype=None):
    """One-time layout prep for the Replicate()'d Linear parameters.

    weight: (Dout, Din) PyTorch layout -> (Kp, Np) transposed + lane-padded
    bias:   (Dout,)                    -> (1, Np)
    Hoisted out of the per-forward path: the transpose + pad of the static
    weight happen once, not on every call (saves an extra HBM pass per forward
    and all per-tile transpose work inside the kernel).
    """
    Dout, Din = weight.shape
    w_t = weight.T  # (Din, Dout): contraction dim leads -> plain (tm,tk)@(tk,tn) dot
    if mxu_dtype is not None:
        w_t = w_t.astype(mxu_dtype)
    # K is x's lane axis (needs 128) and w_t's sublane axis (needs 8/16/32);
    # padding K to 128 satisfies both for every supported dtype.
    Kp = _round_up(Din, _LANE)
    Np = _round_up(Dout, _LANE)
    if (Kp, Np) != (Din, Dout):
        w_t = jnp.pad(w_t, ((0, Kp - Din), (0, Np - Dout)))
    b2d = bias.reshape(1, Dout)
    if Np != Dout:
        b2d = jnp.pad(b2d, ((0, 0), (0, Np - Dout)))
    return w_t, b2d


def _linear_fused_kernel(x_ref, w_ref, b_ref, o_ref, *, precision):
    # Single-K-tile path: whole contraction in one MXU call per (i, j) tile.
    acc = jnp.dot(x_ref[...], w_ref[...],
                  preferred_element_type=jnp.float32, precision=precision)
    o_ref[...] = (acc + b_ref[...].astype(jnp.float32)).astype(o_ref.dtype)


def _linear_reduce_kernel(x_ref, w_ref, b_ref, o_ref, acc_ref, *, precision):
    # Grid: (M tiles, N tiles, K tiles); K (axis 2) is the reduction axis.
    k = pl.program_id(2)

    @pl.when(k == 0)
    def _init():
        acc_ref[...] = jnp.zeros_like(acc_ref)

    acc_ref[...] += jnp.dot(x_ref[...], w_ref[...],
                            preferred_element_type=jnp.float32,
                            precision=precision)

    @pl.when(k == pl.num_programs(2) - 1)
    def _finalize():
        # Bias add + dtype cast once, on the last K step (f32 epilogue).
        o_ref[...] = (acc_ref[...] + b_ref[...].astype(jnp.float32)).astype(o_ref.dtype)


def spmd_linear_forward(x, w_t, b2d, dout, *, max_tm=512, max_tn=512, max_tk=2048,
                        mxu_dtype=None):
    """Forward of SPMD(nn.Linear(Din, Dout), Schema(mesh, [Replicate()])).

    x:    (B, Din)   Shard(0) activation (batch tiled on the M grid axis)
    w_t:  (Kp, Np)   pre-transposed/padded weight from prepare_linear_params (Replicate())
    b2d:  (1, Np)    pre-padded bias (Replicate())
    dout: original Dout (to slice the padded output)
    returns (B, Dout) in x's original dtype
    """
    B, Din = x.shape
    Kp, Np = w_t.shape
    out_dtype = x.dtype
    if mxu_dtype is not None:
        x = x.astype(mxu_dtype)

    sub = _sublane_align(x.dtype)
    Mp, tm = _pad_and_tile(B, sub, max_tm)
    tn = _divisor_tile(Np, _LANE, max_tn)
    collapse_k = Kp <= max_tk
    tk = Kp if collapse_k else _divisor_tile(Kp, _LANE, max_tk)

    # v7x has 2 TensorCores: make sure there are >= 2 independent (i, j) tiles
    # for the "parallel" axes to shard, otherwise one core idles.
    if (Mp // tm) * (Np // tn) < 2 and tm >= 2 * sub:
        tm = (tm // 2) // sub * sub
        Mp = _round_up(B, tm)

    # Zero-pad the activation only when needed (K padding / M remainder).  Zero
    # K columns contribute nothing; padded M rows are sliced off at the end.
    if (Mp, Kp) != (B, Din):
        x = jnp.pad(x, ((0, Mp - B), (0, Kp - Din)))

    precision = (lax.Precision.HIGHEST
                 if x.dtype == jnp.float32 and w_t.dtype == jnp.float32
                 else None)

    if collapse_k:
        grid = (Mp // tm, Np // tn)
        kernel = functools.partial(_linear_fused_kernel, precision=precision)
        grid_spec = pltpu.PrefetchScalarGridSpec(
            num_scalar_prefetch=0,
            grid=grid,
            in_specs=[
                pl.BlockSpec((tm, Kp), lambda i, j: (i, 0)),  # Shard(0) activation
                pl.BlockSpec((Kp, tn), lambda i, j: (0, j)),  # Replicate() weight (pre-T)
                pl.BlockSpec((1, tn), lambda i, j: (0, j)),   # Replicate() bias
            ],
            out_specs=pl.BlockSpec((tm, tn), lambda i, j: (i, j)),
        )
        dim_sem = ("parallel", "parallel")
    else:
        grid = (Mp // tm, Np // tn, Kp // tk)
        kernel = functools.partial(_linear_reduce_kernel, precision=precision)
        grid_spec = pltpu.PrefetchScalarGridSpec(
            num_scalar_prefetch=0,
            grid=grid,
            in_specs=[
                pl.BlockSpec((tm, tk), lambda i, j, k: (i, k)),
                pl.BlockSpec((tk, tn), lambda i, j, k: (k, j)),
                pl.BlockSpec((1, tn), lambda i, j, k: (0, j)),
            ],
            out_specs=pl.BlockSpec((tm, tn), lambda i, j, k: (i, j)),
            scratch_shapes=[pltpu.VMEM((tm, tn), jnp.float32)],
        )
        dim_sem = ("parallel", "parallel", "arbitrary")

    out_padded = pl.pallas_call(
        kernel,
        out_shape=jax.ShapeDtypeStruct((Mp, Np), out_dtype),
        grid_spec=grid_spec,
        compiler_params=pltpu.CompilerParams(
            dimension_semantics=dim_sem,
            vmem_limit_bytes=_VMEM_LIMIT_BYTES,
        ),
    )(x, w_t, b2d)

    if (Mp, Np) != (B, dout):
        out_padded = out_padded[:B, :dout]
    return out_padded


if __name__ == "__main__":
    # Small shapes consistent with a data-parallel Linear: batch=16, hidden=32.
    B, Din, Dout = 16, 32, 32

    key = jax.random.PRNGKey(0)
    kx, kw, kb = jax.random.split(key, 3)
    x = jax.random.normal(kx, (B, Din), dtype=jnp.float32)
    weight = jax.random.normal(kw, (Dout, Din), dtype=jnp.float32) * 0.1
    bias = jax.random.normal(kb, (Dout,), dtype=jnp.float32) * 0.1

    # One-time parameter layout prep (Replicate()'d weight/bias), then forward.
    w_t, b2d = prepare_linear_params(weight, bias)
    out = spmd_linear_forward(x, w_t, b2d, Dout)
    out = jax.block_until_ready(out)

    # Reference: plain JAX forward of the local module.
    ref = x @ weight.T + bias
    assert out.shape == (B, Dout)
    assert jnp.allclose(out, ref, atol=1e-5, rtol=1e-5), "mismatch vs reference"

    print("KERNEL_OK")
</pallas_src>

<mosaic_0001>
module attributes {stable_mosaic.version = 11 : i64} {
  func.func @_linear_fused_kernel(%arg0: i32, %arg1: i32, %arg2: memref<8x128xf32, #tpu.memory_space<vmem>>, %arg3: memref<128x128xf32, #tpu.memory_space<vmem>>, %arg4: memref<1x128xf32, #tpu.memory_space<vmem>>, %arg5: memref<8x128xf32, #tpu.memory_space<vmem>>) attributes {dimension_semantics = [#tpu.dimension_semantics<parallel>, #tpu.dimension_semantics<parallel>], iteration_bounds = array<i64: 2, 1>, scalar_prefetch = 0 : i64, scratch_operands = 0 : i64, tpu.core_type = #tpu.core_type<tc>, window_params = [{transform_indices = @transform_0, window_bounds = array<i64: 8, 128>}, {transform_indices = @transform_1, window_bounds = array<i64: 128, 128>}, {transform_indices = @transform_2, window_bounds = array<i64: 1, 128>}, {transform_indices = @transform_3, window_bounds = array<i64: 8, 128>}]} {
    %c0 = arith.constant 0 : index
    %c0_0 = arith.constant 0 : index
    %0 = vector.load %arg2[%c0, %c0_0] : memref<8x128xf32, #tpu.memory_space<vmem>>, vector<8x128xf32>
    %c0_1 = arith.constant 0 : index
    %c0_2 = arith.constant 0 : index
    %1 = vector.load %arg3[%c0_1, %c0_2] : memref<128x128xf32, #tpu.memory_space<vmem>>, vector<128x128xf32>
    %cst = arith.constant dense<0.000000e+00> : vector<8x128xf32>
    %2 = tpu.matmul %0, %1, %cst {dimension_numbers = #tpu.dot_dimension_numbers<[1], [0], [0], [1], [0, 0, 1, 1], [], []>, precision = #tpu.contract_precision<fp32>} : vector<8x128xf32>, vector<128x128xf32>, vector<8x128xf32> -> vector<8x128xf32>
    %c0_3 = arith.constant 0 : index
    %c0_4 = arith.constant 0 : index
    %3 = vector.load %arg4[%c0_3, %c0_4] : memref<1x128xf32, #tpu.memory_space<vmem>>, vector<1x128xf32>
    %4 = vector.broadcast %3 : vector<1x128xf32> to vector<8x128xf32>
    %5 = arith.addf %2, %4 : vector<8x128xf32>
    %c0_5 = arith.constant 0 : index
    %c0_6 = arith.constant 0 : index
    %6 = vector.load %arg5[%c0_5, %c0_6] : memref<8x128xf32, #tpu.memory_space<vmem>>, vector<8x128xf32>
    tpu.vector_store %arg5[%c0_5, %c0_6], %5 {strides = array<i32>} : memref<8x128xf32, #tpu.memory_space<vmem>>, vector<8x128xf32>,
    return
  }
  func.func @transform_0(%arg0: i32, %arg1: i32) -> (i32, i32) {
    %c0_i32 = arith.constant 0 : i32
    %c0_i32_0 = arith.constant 0 : i32
    return %arg0, %c0_i32 : i32, i32
  }
  func.func @transform_1(%arg0: i32, %arg1: i32) -> (i32, i32) {
    %c0_i32 = arith.constant 0 : i32
    %c0_i32_0 = arith.constant 0 : i32
    return %c0_i32, %arg1 : i32, i32
  }
  func.func @transform_2(%arg0: i32, %arg1: i32) -> (i32, i32) {
    %c0_i32 = arith.constant 0 : i32
    %c0_i32_0 = arith.constant 0 : i32
    return %c0_i32, %arg1 : i32, i32
  }
  func.func @transform_3(%arg0: i32, %arg1: i32) -> (i32, i32) {
    %c0_i32 = arith.constant 0 : i32
    return %arg0, %arg1 : i32, i32
  }
}

</mosaic_0001>

<bundles_post_ra>
// kernel: tpu_custom_call.1
= control target key start
LH: loop header
LB: loop body
LE: loop exit
PB: predicated region body
PF: predicated region fallthrough
CT: control target
= control target key end

     0   :  { %8 = vsyncpa [#allocation3], 0  ;;  %s2226_s0 = inlined_call_operand.hbm [shape: f32[16,128], index: 0, kind: input, shape index: {}]   ;;  %s2227_s1 = inlined_call_operand.hbm [shape: f32[128,128], index: 1, kind: input, shape index: {}]   ;;  %s2228_s2 = inlined_call_operand.vmem [shape: f32[1,128], index: 2, kind: input, shape index: {}]   ;;  %s2229_s3 = inlined_call_operand.hbm [shape: f32[16,128], index: 3, kind: output, shape index: {}]  }
   0x1   :  { %10 = vsyncpa [#allocation3 + $0x1], 0 }
   0x2   :  { %11 = vsyncpa [#allocation6], 0 }
   0x3   :  { %12 = vsyncpa [#allocation4], 0 }
   0x4   :  { %14 = vsyncpa [#allocation4 + $0x1], 0  ;;  %s1755_s12 = smov 0   ;;  %s1757_s13 = smov 0  }
   0x5   :  { %s1759_s14 = smov 0   ;;  %s1761_s15 = smov 0  }
   0x6   :  { %s1763_s16 = smov 0   ;;  %s1765_s17 = smov 0  }
   0x7 LB: > { %s1020_s18 = sadd.s32 4294967295, %s1725_s17   ;;  %s1021_s19 = sadd.s32 4294967294, %s1725_s17   ;;  %s1725_s17 = sphi %s1765_s17, %s20_s17   ;;  %s1721_s16 = sphi %s1763_s16, %s2253_s16   ;;  %s1717_s15 = sphi %s1761_s15, %s2252_s15   ;;  %s1713_s14 = sphi %s1759_s14, %s2251_s14   ;;  %s1709_s13 = sphi %s1757_s13, %s2250_s13   ;;  %s1705_s12 = sphi %s1755_s12, %s2249_s12  }
   0x8   : > { %p52_p0 = scmp.ne.s32.totalorder %s1709_s13, %s1705_s12  ;;  %p1789_p1 = scmp.eq.s32.totalorder %s1020_s18, 0 }
   0x9   : > { %p1793_p2 = scmp.eq.s32.totalorder %s1020_s18, 1  ;;  %p136_p3 = scmp.eq.s32.totalorder %s1021_s19, 1 }
   0xa   : > { %s2234_s20 = scalar_select %p1789_p1, 1, 0 }
   0xb   : > { %s2235_s21 = scalar_select %p1793_p2, 1, 0 }
   0xc   : > { %p1799_p4 = por %p1789_p1, %p52_p0  ;;  %p1022_p5 = scmp.ge.s32.totalorder %s1725_s17, 1 }
   0xd   : > { %p1804_p6 = por %p136_p3, %p52_p0  ;;  %p143_p7 = scmp.lt.s32.totalorder %s1725_s17, 3 }
   0xe   : > { %s2236_s22 = scalar_select %p1799_p4, 1, 0 }
   0xf   : > { %s2237_s23 = scalar_select %p1804_p6, 1, 0 }
  0x10   : > { %p1809_p8 = pnand %p1022_p5, %p143_p7  ;;  %s1727_s25 = smov [#allocation5]  }
  0x11   : > { %s157_s26 = sshll.u32 %s1727_s25, 4  ;;  %s32_s28 = sadd.s32 1, %s1721_s16  ;;  %s158_s26 = int_to_ptr.vmem [resolvable:$true] %s157_s26 }
  0x12   : > { %s2238_s24 = scalar_select %p1809_p8, 1, 0 }
  0x13   : > { %p1511_p9 = pneg %p1809_p8  ;;  %s1581_s4 = scalar_lea.hbm %s2227_s1, 2048 }
  0x14   : > { %p1582_p12 = scmp.ne.s32.totalorder %s2227_s1, %s1581_s4  ;;  %p1588_p5 = scmp.lt.u32.totalorder %s1581_s4, %s2227_s1 }
  0x15   : > { %p1818_p11 = pnand %p1511_p9, %p1789_p1 }
  0x17   : > { %p1583_p13 = pneg %p1818_p11 }
  0x19   : > { %p1584_p0 = pnand %p1583_p13, %p1582_p12 }
  0x1b   : > { %p1585_p3 = pneg %p1584_p0 }
  0x1d   : > { %p1590_p7 = pnand %p1588_p5, %p1585_p3 }
  0x1f   : > { %1593 = shalt.err (!%p1590_p7)
}
  0x20   : > { %s1594_s9 = scalar_lea.vmem %s158_s26, 2048  ;;  %p1602_p1 = scmp.lt.s32.totalorder %s158_s26, %s158_s26 }
  0x21   : > { %p1595_p9 = scmp.ne.s32.totalorder %s158_s26, %s1594_s9  ;;  %p1603_p4 = scmp.lt.s32.totalorder %s1594_s9, %s1594_s9 }
  0x23   : > { %p1597_p10 = pnand %p1595_p9, %p1583_p13  ;;  %p1604_p8 = por %p1603_p4, %p1602_p1 }
  0x25   : > { %p1598_p6 = pneg %p1597_p10 }
  0x27   : > { %p1605_p2 = pnand %p1604_p8, %p1598_p6 }
  0x29   : > { %1608 = shalt.err (!%p1605_p2)
}
  0x2a   : > { %s1728_s10 = smov 128   ;;  %s1729_s11 = smov 8  }
  0x2b   : > { %1514 = dma.hbm_to_vmem [thread:$0]  (!%p1818_p11), %s2227_s1, 2048, %s158_s26, [#allocation6], %s1728_s10, %s1728_s10, %s1729_s11  }
  0x2c   : > { %p34_p1 = scmp.ge.s32.totalorder %s32_s28, 2  ;;  %s39_s25 = sadd.s32 1, %s1713_s14 }
  0x2d   : > { %p46_p2 = scmp.ne.s32.totalorder %s1713_s14, %s1709_s13  ;;  %p47_p4 = scmp.eq.s32.totalorder %s1725_s17, 0 }
  0x2e   : > { %s2255_s28 = smov (%p34_p1, %s32_s28), 0  ;;  %p2241_p8 = scmp.ne.s32.totalorder %s2235_s21, 0 }
  0x2f   : > { %p1845_p6 = por %p47_p4, %p46_p2  ;;  %s36_s27 = ssub.s32 %s1721_s16, %s2255_s28 }
  0x30   : > { %p1851_p10 = por %p2241_p8, %p46_p2  ;;  %p1524_p12 = scmp.lt.s32.totalorder %s1725_s17, 2 }
  0x31   : > { %p37_p11 = scmp.eq.s32.totalorder %s36_s27, 0  ;;  %s177_s26 = sand.u32 1, %s1713_s14  }
  0x32   : > { %s1026_s4 = sshll.u32 %s177_s26, 3  ;;  %s1027_s6 = sshll.u32 %s1721_s16, 7 }
  0x33   : > { %s1860_s5 = scalar_select %p37_p11, %s1713_s14, %s39_s25  }
  0x34   : > { %s1866_s9 = scalar_lea.hbm %s2226_s0, %s1027_s6  ;;  %s181_s21 = scalar_lea.vmem [#allocation2], %s1026_s4 }
  0x35   : > { %s188_s10 = sshll.u32 %s181_s21, 4  ;;  %p1872_p13 = pnand %p1524_p12, %p1845_p6  ;;  %s1868_s10 = int_to_ptr.vmem [resolvable:$true] %s188_s10 }
  0x36   : > { %s178_s18 = scalar_lea.sflag [#allocation3], %s177_s26  ;;  %s1609_s19 = scalar_lea.hbm %s1866_s9, 128 }
  0x37   : > { %p1610_p0 = scmp.ne.s32.totalorder %s1866_s9, %s1609_s19  ;;  %p1611_p3 = pneg %p1872_p13 }
  0x38   : > { %s1614_s4 = scalar_lea.hbm %s2226_s0, 256  ;;  %p1615_p9 = scmp.lt.u32.totalorder %s1866_s9, %s2226_s0 }
  0x39   : > { %p1612_p5 = pnand %p1611_p3, %p1610_p0  ;;  %p1616_p1 = scmp.lt.u32.totalorder %s1614_s4, %s1609_s19 }
  0x3a   : > { %p1618_p4 = scmp.lt.u32.totalorder %s1609_s19, %s1866_s9 }
  0x3b   : > { %p1613_p7 = pneg %p1612_p5  ;;  %p1617_p2 = por %p1616_p1, %p1615_p9 }
  0x3d   : > { %p1619_p6 = por %p1618_p4, %p1617_p2 }
  0x3f   : > { %p1620_p8 = pnand %p1619_p6, %p1613_p7 }
  0x41   : > { %1623 = shalt.err (!%p1620_p8)
}
  0x42   : > { %s1624_s26 = scalar_lea.vmem %s1868_s10, 128  ;;  %s1730_s7 = smov [#allocation2]  }
  0x43   : > { %p1625_p12 = scmp.ne.s32.totalorder %s1868_s10, %s1624_s26  ;;  %s1629_s8 = sshll.u32 %s1730_s7, 4  ;;  %s1630_s8 = int_to_ptr.vmem [resolvable:$false] %s1629_s8 }
  0x44   : > { %s1631_s21 = scalar_lea.vmem %s1630_s8, 256  ;;  %p1632_p5 = scmp.lt.s32.totalorder %s1868_s10, %s1630_s8 }
  0x45   : > { %p1627_p11 = pnand %p1625_p12, %p1611_p3  ;;  %p1633_p9 = scmp.lt.s32.totalorder %s1631_s21, %s1624_s26 }
  0x47   : > { %p1628_p0 = pneg %p1627_p11  ;;  %p1634_p1 = por %p1633_p9, %p1632_p5 }
  0x49   : > { %p1635_p2 = pnand %p1634_p1, %p1628_p0 }
  0x4b   : > { %1638 = shalt.err (!%p1635_p2)
}
  0x4c   : > { %1518 = dma.hbm_to_vmem [thread:$0]  (!%p1872_p13), %s1866_s9, 128, %s1868_s10, %s178_s18  }
  0x4d   : > { %p2244_p7 = scmp.ne.s32.totalorder %s2238_s24, 0 }
  0x4e   : > { %s1904_s19 = sand.u32 (!%p2244_p7), 1, %s1709_s13   ;;  %p2245_p3 = scmp.ne.s32.totalorder (!%p2244_p7), %s2236_s22, 0 }
  0x4f   : > { %197 = sbr.rel (%p2244_p7) target bundleno = 421 (0x1a5), region = 32  ;;  %s1029_s25 = sshll.u32 (!%p2244_p7), %s1904_s19, 3 }
  0x50   : > { %s200_s27 = scalar_lea.sflag (!%p2244_p7), [#allocation3], %s1904_s19  ;;  %s1910_s4 = scalar_lea.vmem (!%p2244_p7), [#allocation2], %s1029_s25 }
  0x56   : > { %1692 = dma.done.wait (%p2245_p3), %s200_s27, 128  }
  0x57   : > { %1694 = vsyncadd (%p2245_p3), %s200_s27, 4294967168  ;;  %p2246_p13 = scmp.ne.s32.totalorder %s2234_s20, 0 }
  0x59   : > { %1696 = dma.done.wait (%p2246_p13), [#allocation6], 2048  }
  0x5a   : > { %1698 = vsyncadd (%p2246_p13), [#allocation6], 4294965248  ;;  %v1731_v0 = vmov 0.0|0.0   ;;  %vm1732_vm0 = vmmov 0   ;;  %v1733_v1 = vmov 0.0   ;;  %v237_v2 = vld [vmem:[#allocation5] sm:$0xff] }
  0x5b   : > { %1349 = vmatprep.subr.bf16.mxu1 %v1731_v0  ;;  %1421 = vmatprep.subr.bf16.mxu0 %v1731_v0  ;;  %v238_v3 = vld [vmem:[#allocation5 + $0x8] sm:$0xff]  ;;  %v239_v4 = vld [vmem:[#allocation5 + $0x10] sm:$0xff]  ;;  %v261_v5 = vand.u32 4294901760, %v237_v2  ;;  %v240_v7 = vld [vmem:[#allocation5 + $0x18] sm:$0xff]  ;;  %s1034_s24 = sshll.u32 %s1717_s15, 7  ;;  %s232_s9 = scalar_lea.vmem [#allocation7], %s1029_s25 }
  0x5c   : > { %1171 = vmatprep.mubr.msk.f32.mxu1 %vm1732_vm0, %v1733_v1  ;;  %1276 = vmatprep.mubr.msk.f32.mxu0 %vm1732_vm0, %v1733_v1  ;;  %v264_v6 = vand.u32 4294901760, %v238_v3  ;;  %v267_v8 = vand.u32 4294901760, %v239_v4  ;;  %v270_v9 = vand.u32 4294901760, %v240_v7  ;;  %v241_v10 = vld [vmem:[#allocation5 + $0x20] sm:$0xff]  ;;  %v242_v11 = vld [vmem:[#allocation5 + $0x28] sm:$0xff]  ;;  %v243_v16 = vld [vmem:[#allocation5 + $0x30] sm:$0xff]  ;;  %s2177_s29 = scalar_lea.hbm %s2229_s3, %s1034_s24 }
  0x5d   : > { %v273_v14 = vand.u32 4294901760, %v241_v10  ;;  %v276_v15 = vand.u32 4294901760, %v242_v11  ;;  %v244_v17 = vld [vmem:[#allocation5 + $0x38] sm:$0xff]  ;;  %v279_v19 = vand.u32 4294901760, %v243_v16  ;;  %v1940_v21 = vld [vmem:[#allocation5 + $0x40] sm:$0xff]  ;;  %v1942_v22 = vld [vmem:[#allocation5 + $0x48] sm:$0xff]  ;;  %v1957_v29 = vsub.f32 %v237_v2, %v261_v5 }
  0x5e   : > { %v1926_v12 = vpack.c.bf16 %v264_v6, %v261_v5  ;;  %v1930_v13 = vpack.c.bf16 %v270_v9, %v267_v8  ;;  %v282_v20 = vand.u32 4294901760, %v244_v17  ;;  %v285_v24 = vand.u32 4294901760, %v1940_v21  ;;  %v236_v26 = vld [vmem:[%s1910_s4] sm:$0xff]  ;;  %v1969_v35 = vld [vmem:[#allocation5 + $0x60] sm:$0xff]  ;;  %v1973_v36 = vld [vmem:[#allocation5 + $0x68] sm:$0xff]  ;;  %s917_s10 = sshll.u32 %s232_s9, 4  ;;  %s2179_s10 = int_to_ptr.vmem [resolvable:$true] %s917_s10 }
  0x5f   : > { %v1936_v18 = vpack.c.bf16 %v276_v15, %v273_v14  ;;  %v288_v25 = vand.u32 4294901760, %v1942_v22  ;;  %v1953_v27 = vld [vmem:[#allocation5 + $0x50] sm:$0xff]  ;;  %v1955_v28 = vld [vmem:[#allocation5 + $0x58] sm:$0xff]  ;;  %v1959_v30 = vand.u32 4294901760, %v236_v26  ;;  %v1961_v31 = vsub.f32 %v238_v3, %v264_v6  ;;  %s903_s6 = scalar_lea.sflag [#allocation4], %s1904_s19  ;;  %s1639_s15 = scalar_lea.vmem %s2179_s10, 128 }
  0x60   : > { %1351 = vmatpush3.bf16.msra.mxu1 %v1926_v12  ;;  %1423 = vmatpush3.bf16.msra.mxu0 %v1926_v12  ;;  %v1946_v23 = vpack.c.bf16 %v282_v20, %v279_v19  ;;  %v291_v33 = vand.u32 4294901760, %v1953_v27  ;;  %v294_v34 = vand.u32 4294901760, %v1955_v28  ;;  %v1975_v37 = vsub.f32 %v239_v4, %v267_v8  ;;  %v1992_v43 = vld [vmem:[#allocation5 + $0x70] sm:$0xff]  ;;  %v1994_v44 = vld [vmem:[#allocation5 + $0x78] sm:$0xff]  ;;  %p1640_p4 = scmp.ne.s32.totalorder %s2179_s10, %s1639_s15  ;;  %s1734_s26 = smov [#allocation7]  }
  0x61   : > { %1352 = vmatprep.subr.bf16.mxu1 %v1731_v0  ;;  %1424 = vmatprep.subr.bf16.mxu0 %v1731_v0  ;;  %v1965_v32 = vpack.c.bf16 %v288_v25, %v285_v24  ;;  %v1977_v38 = vsub.f32 %v240_v7, %v270_v9  ;;  %v297_v39 = vand.u32 4294901760, %v1969_v35  ;;  %v1981_v40 = vsub.f32 %v236_v26, %v1959_v30  ;;  %s1643_s7 = sshll.u32 %s1734_s26, 4  ;;  %s1644_s7 = int_to_ptr.vmem [resolvable:$false] %s1643_s7 }
  0x62   : > { %v1989_v41 = vpack.c.bf16 %v294_v34, %v291_v33  ;;  %v300_v42 = vand.u32 4294901760, %v1973_v36  ;;  %v354_v45 = vand.u32 4294901760, %v1957_v29  ;;  %v361_v46 = vand.u32 4294901760, %v1961_v31  ;;  %p1641_p6 = pnand %p1640_p4, %p1851_p10  ;;  %s1645_s8 = scalar_lea.vmem %s1644_s7, 256 }
  0x63   : > { %v2000_v47 = vsub.f32 %v241_v10, %v273_v14  ;;  %v2002_v48 = vsub.f32 %v242_v11, %v276_v15  ;;  %v303_v49 = vand.u32 4294901760, %v1992_v43  ;;  %v306_v50 = vand.u32 4294901760, %v1994_v44  ;;  %p1646_p12 = scmp.lt.s32.totalorder %s2179_s10, %s1644_s7  ;;  %p1647_p11 = scmp.lt.s32.totalorder %s1645_s8, %s1639_s15 }
  0x64   : > { %1354 = vmatpush3.bf16.msra.mxu1 %v1930_v13  ;;  %1426 = vmatpush3.bf16.msra.mxu0 %v1930_v13  ;;  %v343_v51 = vand.u32 4294901760, %v1981_v40  ;;  %v368_v52 = vand.u32 4294901760, %v1975_v37  ;;  %v2014_v53 = vpack.c.bf16 %v300_v42, %v297_v39  ;;  %v355_v54 = vsub.f32 %v1957_v29, %v354_v45  ;;  %p1642_p8 = pneg %p1641_p6 }
  0x65   : > { %1355 = vmatprep.subr.bf16.mxu1 %v1731_v0  ;;  %1427 = vmatprep.subr.bf16.mxu0 %v1731_v0  ;;  %v362_v55 = vsub.f32 %v1961_v31, %v361_v46  ;;  %v375_v56 = vand.u32 4294901760, %v1977_v38  ;;  %v2021_v57 = vsub.f32 %v243_v16, %v279_v19  ;;  %v2023_v58 = vsub.f32 %v244_v17, %v282_v20  ;;  %p1648_p0 = por %p1647_p11, %p1646_p12 }
  0x66   : > { %v344_v59 = vsub.f32 %v1981_v40, %v343_v51  ;;  %v369_v60 = vsub.f32 %v1975_v37, %v368_v52  ;;  %v382_v61 = vand.u32 4294901760, %v2000_v47  ;;  %v389_v62 = vand.u32 4294901760, %v2002_v48 }
  0x67   : > { %v2035_v63 = vpack.c.bf16 %v306_v50, %v303_v49  ;;  %v356_v2 = vand.u32 4294901760, %v355_v54  ;;  %v363_v3 = vand.u32 4294901760, %v362_v55  ;;  %v376_v4 = vsub.f32 %v1977_v38, %v375_v56  ;;  %p1649_p5 = pnand %p1648_p0, %p1642_p8 }
  0x68   : > { %1357 = vmatpush3.bf16.msra.mxu1 %v1936_v18  ;;  %1429 = vmatpush3.bf16.msra.mxu0 %v1936_v18  ;;  %v2041_v5 = vsub.f32 %v1940_v21, %v285_v24  ;;  %v2044_v6 = vsub.f32 %v1942_v22, %v288_v25  ;;  %v1446_v7 = vpack.c.bf16 %v361_v46, %v354_v45  ;;  %v345_v8 = vand.u32 4294901760, %v344_v59 }
  0x69   : > { %1358 = vmatprep.subr.bf16.mxu1 %v1731_v0  ;;  %1430 = vmatprep.subr.bf16.mxu0 %v1731_v0  ;;  %v370_v9 = vand.u32 4294901760, %v369_v60  ;;  %v383_v10 = vsub.f32 %v2000_v47, %v382_v61  ;;  %v390_v11 = vsub.f32 %v2002_v48, %v389_v62  ;;  %v1374_v14 = vpack.c.bf16 %v363_v3, %v356_v2 }
  0x6a   : > { %v377_v15 = vand.u32 4294901760, %v376_v4  ;;  %v396_v16 = vand.u32 4294901760, %v2021_v57  ;;  %v403_v17 = vand.u32 4294901760, %v2023_v58  ;;  %v2057_v19 = vsub.f32 %v1953_v27, %v291_v33 }
  0x6b   : > { %v2062_v20 = vsub.f32 %v1955_v28, %v294_v34  ;;  %v1449_v21 = vpack.c.bf16 %v375_v56, %v368_v52  ;;  %v384_v22 = vand.u32 4294901760, %v383_v10  ;;  %v391_v24 = vand.u32 4294901760, %v390_v11 }
  0x6c   : > { %1360 = vmatpush3.bf16.msra.mxu1 %v1946_v23  ;;  %1432 = vmatpush3.bf16.msra.mxu0 %v1946_v23  ;;  %v410_v25 = vand.u32 4294901760, %v2041_v5  ;;  %v1377_v26 = vpack.c.bf16 %v377_v15, %v370_v9  ;;  %v397_v45 = vsub.f32 %v2021_v57, %v396_v16  ;;  %v404_v27 = vsub.f32 %v2023_v58, %v403_v17 }
  0x6d   : > { %1361 = vmatprep.subr.bf16.mxu1 %v1731_v0  ;;  %1433 = vmatprep.subr.bf16.mxu0 %v1731_v0  ;;  %v417_v33 = vand.u32 4294901760, %v2044_v6  ;;  %v2073_v28 = vsub.f32 %v1969_v35, %v297_v39  ;;  %v2078_v34 = vsub.f32 %v1973_v36, %v300_v42  ;;  %v1380_v46 = vpack.c.bf16 %v391_v24, %v384_v22 }
  0x6e   : > { %v411_v52 = vsub.f32 %v2041_v5, %v410_v25  ;;  %v424_v54 = vand.u32 4294901760, %v2057_v19  ;;  %v398_v35 = vand.u32 4294901760, %v397_v45  ;;  %v405_v39 = vand.u32 4294901760, %v404_v27 }
  0x6f   : > { %v418_v55 = vsub.f32 %v2044_v6, %v417_v33  ;;  %v431_v36 = vand.u32 4294901760, %v2062_v20  ;;  %v2093_v42 = vsub.f32 %v1992_v43, %v303_v49  ;;  %v2098_v56 = vsub.f32 %v1994_v44, %v306_v50 }
  0x70   : > { %1363 = vmatpush3.bf16.msra.mxu1 %v1965_v32  ;;  %1435 = vmatpush3.bf16.msra.mxu0 %v1965_v32  ;;  %v1455_v59 = vpack.c.bf16 %v403_v17, %v396_v16  ;;  %v412_v60 = vand.u32 4294901760, %v411_v52  ;;  %v1383_v2 = vpack.c.bf16 %v405_v39, %v398_v35  ;;  %v445_v43 = vand.u32 4294901760, %v2078_v34 }
  0x71   : > { %1364 = vmatprep.subr.bf16.mxu1 %v1731_v0  ;;  %1436 = vmatprep.subr.bf16.mxu0 %v1731_v0  ;;  %v419_v3 = vand.u32 4294901760, %v418_v55  ;;  %v432_v4 = vsub.f32 %v2062_v20, %v431_v36  ;;  %v1458_v44 = vpack.c.bf16 %v417_v33, %v410_v25  ;;  %v459_v11 = vand.u32 4294901760, %v2098_v56 }
  0x72   : > { %v446_v10 = vsub.f32 %v2078_v34, %v445_v43 }
  0x73   : > { %v433_v9 = vand.u32 4294901760, %v432_v4  ;;  %v460_v22 = vsub.f32 %v2098_v56, %v459_v11 }
  0x74   : > { %1366 = vmatpush3.bf16.msra.mxu1 %v1989_v41  ;;  %1438 = vmatpush3.bf16.msra.mxu0 %v1989_v41  ;;  %v447_v17 = vand.u32 4294901760, %v446_v10 }
  0x75   : > { %1367 = vmatprep.subr.bf16.mxu1 %v1731_v0  ;;  %1439 = vmatprep.subr.bf16.mxu0 %v1731_v0  ;;  %v461_v45 = vand.u32 4294901760, %v460_v22 }
  0x78   : > { %1369 = vmatpush3.bf16.msra.mxu1 %v2014_v53  ;;  %1441 = vmatpush3.bf16.msra.mxu0 %v2014_v53 }
  0x79   : > { %1370 = vmatprep.subr.bf16.mxu1 %v1731_v0  ;;  %1442 = vmatprep.subr.bf16.mxu0 %v1731_v0 }
  0x7c   : > { %1372 = vmatpush3.bf16.msra.mxu1 %v2035_v63  ;;  %1444 = vmatpush3.bf16.msra.mxu0 %v2035_v63 }
  0x7d   : > { %1373 = vmatprep.subr.bf16.mxu1 %v1731_v0  ;;  %1445 = vmatprep.subr.bf16.mxu0 %v1731_v0 }
  0x7f   : > { %1172 = vmatmul.mubr.f32.vlgmr.msra.gmra.mrb[0].mxu1 %v345_v8  ;;  %1277 = vmatmul.mubr.f32.vlgmr.msra.gmra.mrb[0].mxu0 %v343_v51  ;;  %v1452_v51 = vpack.c.bf16 %v389_v62, %v382_v61  ;;  %v425_v61 = vsub.f32 %v2057_v19, %v424_v54  ;;  %v438_v62 = vand.u32 4294901760, %v2073_v28  ;;  %v1386_v8 = vpack.c.bf16 %v419_v3, %v412_v60 }
  0x80   : > { %1375 = vmatpush3.bf16.msra.mxu1 %v1374_v14  ;;  %1447 = vmatpush3.bf16.msra.mxu0 %v1446_v7  ;;  %v452_v7 = vand.u32 4294901760, %v2093_v42  ;;  %v1461_v14 = vpack.c.bf16 %v431_v36, %v424_v54 }
  0x81   : > { %1376 = vmatprep.subr.bf16.mxu1 %v1731_v0  ;;  %1448 = vmatprep.subr.bf16.mxu0 %v1731_v0  ;;  %v426_v49 = vand.u32 4294901760, %v425_v61  ;;  %v439_v50 = vsub.f32 %v2073_v28, %v438_v62  ;;  %v1464_v25 = vpack.c.bf16 %v445_v43, %v438_v62 }
  0x82   : > { %1206 = vmatprep.mubr.msk.f32.mxu1 %vm1732_vm0, %v1733_v1  ;;  %1311 = vmatprep.mubr.msk.f32.mxu0 %vm1732_vm0, %v1733_v1  ;;  %v1467_v33 = vpack.c.bf16 %v459_v11, %v452_v7 }
  0x83   : > { %v440_v15 = vand.u32 4294901760, %v439_v50  ;;  %v1389_v16 = vpack.c.bf16 %v433_v9, %v426_v49 }
  0x84   : > { %1378 = vmatpush3.bf16.msra.mxu1 %v1377_v26  ;;  %1450 = vmatpush3.bf16.msra.mxu0 %v1449_v21  ;;  %v453_v21 = vsub.f32 %v2093_v42, %v452_v7 }
  0x85   : > { %1379 = vmatprep.subr.bf16.mxu1 %v1731_v0  ;;  %1451 = vmatprep.subr.bf16.mxu0 %v1731_v0  ;;  %v1392_v24 = vpack.c.bf16 %v447_v17, %v440_v15 }
  0x86   : > { %v454_v26 = vand.u32 4294901760, %v453_v21 }
  0x88   : > { %1381 = vmatpush3.bf16.msra.mxu1 %v1380_v46  ;;  %1453 = vmatpush3.bf16.msra.mxu0 %v1452_v51  ;;  %v1395_v27 = vpack.c.bf16 %v461_v45, %v454_v26  ;;  %v1398_v46 = vpack.c.bf16 %v1961_v31, %v1957_v29  ;;  %v1401_v51 = vpack.c.bf16 %v1977_v38, %v1975_v37  ;;  %v1032_v31 = vld [vmem:[%s2228_s2] ss:$0 sm:$0xff] }
  0x89   : > { %1382 = vmatprep.subr.bf16.mxu1 %v1731_v0  ;;  %1454 = vmatprep.subr.bf16.mxu0 %v1731_v0  ;;  %v1404_v29 = vpack.c.bf16 %v2002_v48, %v2000_v47 }
  0x8c   : > { %1384 = vmatpush3.bf16.msra.mxu1 %v1383_v2  ;;  %1456 = vmatpush3.bf16.msra.mxu0 %v1455_v59 }
  0x8d   : > { %1385 = vmatprep.subr.bf16.mxu1 %v1731_v0  ;;  %1457 = vmatprep.subr.bf16.mxu0 %v1731_v0 }
  0x90   : > { %1387 = vmatpush3.bf16.msra.mxu1 %v1386_v8  ;;  %1459 = vmatpush3.bf16.msra.mxu0 %v1458_v44 }
  0x91   : > { %1388 = vmatprep.subr.bf16.mxu1 %v1731_v0  ;;  %1460 = vmatprep.subr.bf16.mxu0 %v1731_v0 }
  0x94   : > { %1390 = vmatpush3.bf16.msra.mxu1 %v1389_v16  ;;  %1462 = vmatpush3.bf16.msra.mxu0 %v1461_v14 }
  0x95   : > { %1391 = vmatprep.subr.bf16.mxu1 %v1731_v0  ;;  %1463 = vmatprep.subr.bf16.mxu0 %v1731_v0 }
  0x98   : > { %1393 = vmatpush3.bf16.msra.mxu1 %v1392_v24  ;;  %1465 = vmatpush3.bf16.msra.mxu0 %v1464_v25 }
  0x99   : > { %1394 = vmatprep.subr.bf16.mxu1 %v1731_v0  ;;  %1466 = vmatprep.subr.bf16.mxu0 %v1731_v0 }
  0x9c   : > { %1396 = vmatpush3.bf16.msra.mxu1 %v1395_v27  ;;  %1468 = vmatpush3.bf16.msra.mxu0 %v1467_v33 }
  0x9d   : > { %1397 = vmatprep.subr.bf16.mxu1 %v1731_v0  ;;  %1469 = vmatprep.subr.bf16.mxu0 %v1731_v0 }
  0x9f   : > { %1207 = vmatmul.mubr.f32.vlgmr.msra.gmra.mrb[0].mxu1 %v1959_v30  ;;  %1312 = vmatmul.mubr.f32.vlgmr.msra.gmra.mrb[0].mxu0 %v1959_v30 }
  0xa0   : > { %1399 = vmatpush3.bf16.msra.mxu1 %v1398_v46  ;;  %1471 = vmatpush3.bf16.msra.mxu0 %v1926_v12  ;;  %v1407_v12 = vpack.c.bf16 %v2023_v58, %v2021_v57 }
  0xa1   : > { %1400 = vmatprep.subr.bf16.mxu1 %v1731_v0  ;;  %1472 = vmatprep.subr.bf16.mxu0 %v1731_v0 }
  0xa2   : > { %1241 = vmatprep.mubr.msk.f32.mxu1 %vm1732_vm0, %v1733_v1  ;;  %1346 = vmatprep.mubr.msk.f32.mxu0 %vm1732_vm0, %v1733_v1  ;;  %v1410_v1 = vpack.c.bf16 %v2044_v6, %v2041_v5 }
  0xa4   : > { %1402 = vmatpush3.bf16.msra.mxu1 %v1401_v51  ;;  %1474 = vmatpush3.bf16.msra.mxu0 %v1930_v13  ;;  %v1413_v13 = vpack.c.bf16 %v2062_v20, %v2057_v19 }
  0xa5   : > { %1403 = vmatprep.subr.bf16.mxu1 %v1731_v0  ;;  %1475 = vmatprep.subr.bf16.mxu0 %v1731_v0 }
  0xa8   : > { %1405 = vmatpush3.bf16.msra.mxu1 %v1404_v29  ;;  %1477 = vmatpush3.bf16.msra.mxu0 %v1936_v18  ;;  %v1416_v18 = vpack.c.bf16 %v2078_v34, %v2073_v28 }
  0xa9   : > { %1406 = vmatprep.subr.bf16.mxu1 %v1731_v0  ;;  %1478 = vmatprep.subr.bf16.mxu0 %v1731_v0 }
  0xac   : > { %1408 = vmatpush3.bf16.msra.mxu1 %v1407_v12  ;;  %1480 = vmatpush3.bf16.msra.mxu0 %v1946_v23  ;;  %v1419_v23 = vpack.c.bf16 %v2098_v56, %v2093_v42 }
  0xad   : > { %1409 = vmatprep.subr.bf16.mxu1 %v1731_v0  ;;  %1481 = vmatprep.subr.bf16.mxu0 %v1731_v0 }
  0xb0   : > { %1411 = vmatpush3.bf16.msra.mxu1 %v1410_v1  ;;  %1483 = vmatpush3.bf16.msra.mxu0 %v1965_v32 }
  0xb1   : > { %1412 = vmatprep.subr.bf16.mxu1 %v1731_v0  ;;  %1484 = vmatprep.subr.bf16.mxu0 %v1731_v0 }
  0xb4   : > { %1414 = vmatpush3.bf16.msra.mxu1 %v1413_v13  ;;  %1486 = vmatpush3.bf16.msra.mxu0 %v1989_v41 }
  0xb5   : > { %1415 = vmatprep.subr.bf16.mxu1 %v1731_v0  ;;  %1487 = vmatprep.subr.bf16.mxu0 %v1731_v0 }
  0xb8   : > { %1417 = vmatpush3.bf16.msra.mxu1 %v1416_v18  ;;  %1489 = vmatpush3.bf16.msra.mxu0 %v2014_v53 }
  0xb9   : > { %1418 = vmatprep.subr.bf16.mxu1 %v1731_v0  ;;  %1490 = vmatprep.subr.bf16.mxu0 %v1731_v0 }
  0xbc   : > { %1420 = vmatpush3.bf16.msra.mxu1 %v1419_v23  ;;  %1492 = vmatpush3.bf16.msra.mxu0 %v2035_v63 }
  0xbf   : > { %1242 = vmatmul.mubr.f32.vlgmr.msra.gmra.mrb[0].mxu1 %v1981_v40  ;;  %1347 = vmatmul.mubr.f32.vlgmr.msra.gmra.mrb[0].mxu0 %v1959_v30 }
 0x192   : > { %v602_v32 = vpop.f32.mrb[0].mxu1  ;;  %v897_v37 = vpop.f32.mrb[0].mxu0 }
 0x193   : > { %v1493_v0 = vadd.f32 %v1032_v31, %v602_v32  ;;  %v1243_v38 = vpop.f32.mrb[1].mxu1  ;;  %v1348_v41 = vpop.f32.mrb[1].mxu0 }
 0x195   : > { %v1494_v47 = vadd.f32 %v1493_v0, %v897_v37 }
 0x197   : > { %901 = vst [vmem:[%s232_s9] sm:$0xff] %v1494_v47 }
 0x198   : > { %1652 = shalt.err (!%p1649_p5)
}
 0x199   : > { %s1653_s21 = scalar_lea.hbm %s2177_s29, 128  ;;  %s1657_s27 = scalar_lea.hbm %s2229_s3, 256 }
 0x19a   : > { %p1654_p9 = scmp.ne.s32.totalorder %s2177_s29, %s1653_s21  ;;  %p1658_p7 = scmp.lt.u32.totalorder %s2177_s29, %s2229_s3 }
 0x19b   : > { %p1659_p3 = scmp.lt.u32.totalorder %s1657_s27, %s1653_s21  ;;  %p1661_p4 = scmp.lt.u32.totalorder %s1653_s21, %s2177_s29 }
 0x19c   : > { %p1655_p1 = pnand %p1654_p9, %p1851_p10 }
 0x19d   : > { %p1660_p13 = por %p1659_p3, %p1658_p7 }
 0x19e   : > { %p1656_p2 = pneg %p1655_p1 }
 0x19f   : > { %p1662_p6 = por %p1661_p4, %p1660_p13 }
 0x1a1   : > { %p1663_p8 = pnand %p1662_p6, %p1656_p2 }
 0x1a3   : > { %1666 = shalt.err (!%p1663_p8)
}
 0x1a4   : > { %1509 = dma.vmem_to_hbm [thread:$0]  (%p1851_p10), %s2179_s10, 128, %s2177_s29, %s903_s6  }
 0x1a5 PF: > { %s929_s22 = sand.u32 1, %s1705_s12   ;;  %p2247_p12 = scmp.ne.s32.totalorder %s2237_s23, 0 }
 0x1a6   : > { %p2248_p11 = scmp.ge.s32.totalorder %s1725_s17, 2  ;;  %s930_s24 = scalar_lea.sflag [#allocation4], %s929_s22 }
 0x1a8   : > { %p1520_p0 = pnand %p2248_p11, %p2247_p12 }
 0x1aa   : > { %1700 = dma.done.wait (!%p1520_p0), %s930_s24, 128  }
 0x1ab   : > { %1702 = vsyncadd (!%p1520_p0), %s930_s24, 4294967168  ;;  %s20_s17 = sadd.s32 1, %s1725_s17   ;;  %s2249_s12 = smov %s1709_s13 }
 0x1ac   : > { %p17_p5 = scmp.ge.s32.totalorder %s20_s17, 4   ;;  %s2250_s13 = smov %s1713_s14 }
 0x1ad   : > { %s2251_s14 = smov %s1860_s5  ;;  %s2252_s15 = smov %s1721_s16 }
 0x1ae   : > { %s2253_s16 = smov %s2255_s28  ;;  %19 = sbr.rel (!%p17_p5) target bundleno = 7 (0x7), region = 85 }
 0x1b5   :  { %935 = vsyncpa [#allocation3], 1 }
 0x1b6   :  { %937 = vsyncpa [#allocation3 + $0x1], 1 }
 0x1b7   :  { %938 = vsyncpa [#allocation6], 1 }
 0x1b8   :  { %939 = vsyncpa [#allocation4], 1 }
 0x1b9   :  { %941 = vsyncpa [#allocation4 + $0x1], 1 }

</bundles_post_ra>
